<compile_context>
chip_gen: v6e
topology: v6e:2x2x1
jax: 0.10.0
libtpu: 0.0.40
codegen_flags: <defaults>
</compile_context>

<pallas_src>
import math

import jax
import jax.numpy as jnp
from jax.experimental import pallas as pl
from jax.experimental.pallas import tpu as pltpu


def _scale_kernel(x_ref, s_ref, o_ref):
    # x_ref: (TILE_R, TILE_D); s_ref: (1, TILE_D); o_ref: (TILE_R, TILE_D)
    o_ref[...] = (x_ref[...] * s_ref[...]).astype(o_ref.dtype)


def _round_up(a, b):
    return (a + b - 1) // b * b


def _scale_2d(x2, s2):
    """x2: [R, D], s2: [1, D] (same dtype). Returns x2 * s2 via a Pallas kernel."""
    R, D = x2.shape
    itemsize = jnp.dtype(x2.dtype).itemsize
    sub = max(8, 32 // itemsize)            # sublane multiple: 8 f32 / 16 bf16 / 32 int8

    target_bytes = 4 * 1024 * 1024          # ~4 MiB per buffer (>=85% HBM roofline)

    # ---- D-axis tiling: only kicks in for very wide feature dims ----
    if D % 128 == 0 and sub * D * itemsize > target_bytes:
        tile_d = max(128, (target_bytes // (sub * itemsize)) // 128 * 128)
        tile_d = min(tile_d, D)
    else:
        tile_d = D

    # ---- Row-tile sizing: ~target_bytes per (tile_r, tile_d) buffer ----
    row_bytes = max(1, tile_d * itemsize)
    tile_r = max(sub, (target_bytes // row_bytes) // sub * sub)
    if tile_r >= R:
        if R >= 2 * sub:
            # Cap at sublane-rounded R//2: >= 2 grid steps so both v7x TCs stream.
            tile_r = _round_up((R + 1) // 2, sub)
        else:
            tile_r = R                      # full extent is always a legal block dim

    grid = (pl.cdiv(R, tile_r), pl.cdiv(D, tile_d))

    cost = pl.CostEstimate(
        flops=R * D,
        transcendentals=0,
        bytes_accessed=2 * R * D * itemsize + D * itemsize,
    )

    return pl.pallas_call(
        _scale_kernel,
        out_shape=jax.ShapeDtypeStruct((R, D), x2.dtype),
        grid_spec=pl.GridSpec(
            grid=grid,
            in_specs=[
                pl.BlockSpec((tile_r, tile_d), lambda i, j: (i, j)),
                pl.BlockSpec((1, tile_d), lambda i, j: (0, j)),  # row-invariant scale
            ],
            out_specs=pl.BlockSpec((tile_r, tile_d), lambda i, j: (i, j)),
        ),
        compiler_params=pltpu.CompilerParams(
            dimension_semantics=("parallel", "parallel"),
            vmem_limit_bytes=48 << 20,      # <= 64 MiB physical VMEM on v7x
        ),
        cost_estimate=cost,
    )(x2, s2)


def scale_forward(x, scale):
    """x: [..., D], scale: [D] -> x * scale (broadcast over the last dim)."""
    orig_shape = x.shape
    D = orig_shape[-1]
    R = int(math.prod(orig_shape[:-1])) if len(orig_shape) > 1 else 1

    x2 = x.reshape(R, D)
    # Match x's dtype so the kernel multiply stays in x.dtype (output dtype = x.dtype).
    s2 = scale.reshape(1, D).astype(x.dtype)

    # --- Lane-density fold: make the last dim a multiple of 128 where possible ---
    if D % 128 != 0:
        k = 128 // math.gcd(D, 128)
        R_main = (R // k) * k
        if k > 1 and R_main > 0:
            main = _scale_2d(
                x2[:R_main].reshape(R_main // k, k * D),
                jnp.tile(s2, (1, k)),
            ).reshape(R_main, D)
            if R_main < R:
                # <k leftover rows: plain broadcast multiply (tiny, mem-trivial).
                rem = x2[R_main:] * s2
                out2 = jnp.concatenate([main, rem], axis=0)
            else:
                out2 = main
            return out2.reshape(orig_shape)

    return _scale_2d(x2, s2).reshape(orig_shape)


if __name__ == "__main__":
    B, S, D = 2, 8, 32
    key = jax.random.PRNGKey(0)
    kx, ks = jax.random.split(key)
    x = jax.random.normal(kx, (B, S, D), dtype=jnp.float32)

    # Scale parameter: module initializes to init_value * ones(dim); use
    # deterministic non-trivial values (as a trained parameter would hold)
    # so the broadcast path is actually exercised.
    scale = jax.random.normal(ks, (D,), dtype=jnp.float32)

    out = scale_forward(x, scale)
    out = jax.block_until_ready(out)

    # Reference check (plain JAX broadcast, same semantics as PyTorch x * scale).
    ref = x * scale
    assert out.shape == x.shape
    assert jnp.allclose(out, ref, atol=1e-6), "mismatch vs reference"

    print("KERNEL_OK")
</pallas_src>

<mosaic_0001>
module attributes {stable_mosaic.version = 11 : i64} {
  func.func @_scale_kernel(%arg0: i32, %arg1: i32, %arg2: memref<4x128xf32, #tpu.memory_space<vmem>>, %arg3: memref<1x128xf32, #tpu.memory_space<vmem>>, %arg4: memref<4x128xf32, #tpu.memory_space<vmem>>) attributes {dimension_semantics = [#tpu.dimension_semantics<parallel>, #tpu.dimension_semantics<parallel>], iteration_bounds = array<i64: 1, 1>, scalar_prefetch = 0 : i64, scratch_operands = 0 : i64, tpu.core_type = #tpu.core_type<tc>, window_params = [{transform_indices = @transform_0, window_bounds = array<i64: 4, 128>}, {transform_indices = @transform_1, window_bounds = array<i64: 1, 128>}, {transform_indices = @transform_2, window_bounds = array<i64: 4, 128>}]} {
    %c0 = arith.constant 0 : index
    %c0_0 = arith.constant 0 : index
    %0 = vector.load %arg2[%c0, %c0_0] : memref<4x128xf32, #tpu.memory_space<vmem>>, vector<4x128xf32>
    %c0_1 = arith.constant 0 : index
    %c0_2 = arith.constant 0 : index
    %1 = vector.load %arg3[%c0_1, %c0_2] : memref<1x128xf32, #tpu.memory_space<vmem>>, vector<1x128xf32>
    %2 = vector.broadcast %1 : vector<1x128xf32> to vector<4x128xf32>
    %3 = arith.mulf %0, %2 : vector<4x128xf32>
    %c0_3 = arith.constant 0 : index
    %c0_4 = arith.constant 0 : index
    %4 = vector.load %arg4[%c0_3, %c0_4] : memref<4x128xf32, #tpu.memory_space<vmem>>, vector<4x128xf32>
    tpu.vector_store %arg4[%c0_3, %c0_4], %3 {strides = array<i32>} : memref<4x128xf32, #tpu.memory_space<vmem>>, vector<4x128xf32>,
    return
  }
  func.func @transform_0(%arg0: i32, %arg1: i32) -> (i32, i32) {
    %c0_i32 = arith.constant 0 : i32
    return %arg0, %arg1 : i32, i32
  }
  func.func @transform_1(%arg0: i32, %arg1: i32) -> (i32, i32) {
    %c0_i32 = arith.constant 0 : i32
    %c0_i32_0 = arith.constant 0 : i32
    return %c0_i32, %arg1 : i32, i32
  }
  func.func @transform_2(%arg0: i32, %arg1: i32) -> (i32, i32) {
    %c0_i32 = arith.constant 0 : i32
    return %arg0, %arg1 : i32, i32
  }
}

</mosaic_0001>

<bundles_post_ra>
// kernel: tpu_custom_call.1
= control target key start
LH: loop header
LB: loop body
LE: loop exit
PB: predicated region body
PF: predicated region fallthrough
CT: control target
= control target key end

     0   :  { %7 = vsyncpa [#allocation3], 0  ;;  %s122_s0 = inlined_call_operand.hbm [shape: f32[4,128], index: 0, kind: input, shape index: {}]   ;;  %s123_s1 = inlined_call_operand.vmem [shape: f32[1,128], index: 1, kind: input, shape index: {}]   ;;  %s124_s2 = inlined_call_operand.hbm [shape: f32[4,128], index: 2, kind: output, shape index: {}]  }
   0x1   :  { %8 = vsyncpa [#allocation4], 0  ;;  %s96_s9 = smov [#allocation2]  }
   0x2   :  { %s15_s10 = sshll.u32 %s96_s9, 4  ;;  %s16_s10 = int_to_ptr.vmem [resolvable:$true] %s15_s10 }
   0x3   :  { %s60_s11 = scalar_lea.vmem %s16_s10, 64  ;;  %p65_p1 = scmp.lt.s32.totalorder %s16_s10, %s16_s10 }
   0x4   :  { %p61_p0 = scmp.ne.s32.totalorder %s16_s10, %s60_s11  ;;  %p66_p2 = scmp.lt.s32.totalorder %s60_s11, %s60_s11 }
   0x6   :  { %p67_p3 = por %p66_p2, %p65_p1 }
   0x8   :  { %p68_p4 = pnand %p67_p3, %p61_p0 }
   0xa   :  { %71 = shalt.err (!%p68_p4)
}
   0xb   :  { %18 = dma.hbm_to_vmem [thread:$0]  %s122_s0, 64, %s16_s10, [#allocation3]  }
   0xc   :  { %92 = dma.done.wait [#allocation3], 64  }
   0xd   :  { %93 = vsyncadd [#allocation3], 4294967232  ;;  %s97_s14 = smov [#allocation5]   ;;  %v24_v0 = vld [vmem:[#allocation2] sm:$0xf] }
   0xe   :  { %s40_s15 = sshll.u32 %s97_s14, 4  ;;  %v49_v1 = vld [vmem:[%s123_s1] ss:$0 sm:$0xff]  ;;  %s41_s15 = int_to_ptr.vmem [resolvable:$true] %s40_s15 }
   0xf   :  { %v32_v2 = vmul.f32 %v49_v1, %v24_v0  ;;  %s72_s18 = scalar_lea.vmem %s41_s15, 64  ;;  %p77_p6 = scmp.lt.s32.totalorder %s41_s15, %s41_s15 }
  0x10   :  { %p73_p5 = scmp.ne.s32.totalorder %s41_s15, %s72_s18  ;;  %p78_p7 = scmp.lt.s32.totalorder %s72_s18, %s72_s18 }
  0x11   :  { %33 = vst [vmem:[#allocation5] sm:$0xf] %v32_v2 }
  0x12   :  { %p79_p8 = por %p78_p7, %p77_p6 }
  0x14   :  { %p80_p9 = pnand %p79_p8, %p73_p5 }
  0x16   :  { %83 = shalt.err (!%p80_p9)
}
  0x17   :  { %43 = dma.vmem_to_hbm [thread:$0]  %s41_s15, 64, %s124_s2, [#allocation4]  }
  0x18   :  { %94 = dma.done.wait [#allocation4], 64  }
  0x19   :  { %95 = vsyncadd [#allocation4], 4294967232 }
  0x1a   :  { %47 = vsyncpa [#allocation3], 1 }
  0x1b   :  { %48 = vsyncpa [#allocation4], 1 }

</bundles_post_ra>
